<compile_context>
chip_gen: v6e
topology: v6e:2x2x1
jax: 0.10.0
libtpu: 0.0.40
codegen_flags: <defaults>
</compile_context>

<pallas_src>
import jax
import jax.numpy as jnp
from jax.experimental import pallas as pl
from jax.experimental.pallas import tpu as pltpu

_TK_MAX = 2048   # K-tile cap (multiple of 128)
_TM_MAX = 512    # row-tile cap (multiple of 8)


def _round_up(x, m):
    return (x + m - 1) // m * m


def _vmem_limit_bytes():
    # Generation-aware VMEM budget (v5e/v6e: 128 MiB physical, v7x: 64 MiB).
    try:
        cap = int(pltpu.get_tpu_info().vmem_capacity_bytes)
        return int(min(cap * 3 // 4, 64 * 1024 * 1024))
    except Exception:
        return 32 * 1024 * 1024


def prepare_bow_params(weight, bias, *, tk_max=_TK_MAX):
    """One-time parameter preparation (hoisted out of the forward path).

    weight: (num_labels, vocab_size) f32, bias: (num_labels,) f32.
    Returns (w_prep, b_prep):
      w_prep: (vocab_pad, num_labels) bf16, pre-transposed so the kernel's MXU
              contraction is a plain jnp.dot with no in-kernel transpose.
              vocab_pad == vocab_size unless the K axis must be tiled, in
              which case it is zero-padded up to a multiple of 128.
      b_prep: (1, num_labels) f32.
    """
    num_labels, vocab_size = weight.shape
    wt = weight.T.astype(jnp.bfloat16)                       # (vocab, num_labels)
    if vocab_size > tk_max:
        vocab_pad = _round_up(vocab_size, 128)
        wt = jnp.pad(wt, ((0, vocab_pad - vocab_size), (0, 0)))
    b2d = bias.astype(jnp.float32).reshape(1, num_labels)
    return wt, b2d


def _make_bow_kernel(tk, vocab_size, needs_k_mask):
    def kernel(x_ref, w_ref, b_ref, o_ref):
        # x_ref: (tm, tk)         input dtype (f32) -- streamed row/K tile of X
        # w_ref: (tk, num_labels) bf16              -- K-slice of prepared W^T
        # b_ref: (1, num_labels)  f32               -- bias (grid-constant)
        # o_ref: (tm, num_labels) f32               -- resident accumulator/output
        k = pl.program_id(1)

        @pl.when(k == 0)
        def _init():
            o_ref[...] = jnp.zeros_like(o_ref)

        x = x_ref[...]
        if needs_k_mask:
            # Zero the (<128) K-tail columns beyond vocab_size; the matching W
            # rows are zero-padded at prep time, so the reduction stays exact
            # and no unspecified data from the partial X block can leak in.
            col = jax.lax.broadcasted_iota(jnp.int32, x.shape, 1) + k * tk
            x = jnp.where(col < vocab_size, x, 0.0)

        # bf16 cast happens on the fly (no padded bf16 copy of X in HBM);
        # MXU matmul with f32 accumulation directly into the resident output.
        o_ref[...] += jnp.dot(x.astype(jnp.bfloat16), w_ref[...],
                              preferred_element_type=jnp.float32)

        @pl.when(k == pl.num_programs(1) - 1)
        def _epilogue():
            logits = o_ref[...] + b_ref[...]
            m = jnp.max(logits, axis=-1, keepdims=True)
            shifted = logits - m
            lse = jnp.log(jnp.sum(jnp.exp(shifted), axis=-1, keepdims=True))
            o_ref[...] = shifted - lse

    return kernel


def bow_classifier_forward(bow_vec, w_prep, b_prep, *,
                           tm_max=_TM_MAX, tk_max=_TK_MAX):
    """bow_vec: (1, blen, vocab_size); (w_prep, b_prep) from prepare_bow_params.
    Returns (blen, num_labels) log-probabilities."""
    assert bow_vec.ndim == 3 and bow_vec.shape[0] == 1, \
        "reference forward flattens bow_vec[:, b] into one row (batch must be 1)"
    blen, vocab_size = bow_vec.shape[1], bow_vec.shape[2]
    vocab_pad, num_labels = w_prep.shape
    assert vocab_pad >= vocab_size

    x = bow_vec.reshape(blen, vocab_size)   # drop the leading 1; no data copy

    # ---- K (vocab) tiling: tk divides vocab_pad, so no all-zero K columns are
    # ever streamed; any <128-column tail is masked inside the kernel.
    if vocab_pad <= tk_max:
        tk = vocab_pad
    else:
        m128 = vocab_pad // 128          # prep guarantees vocab_pad % 128 == 0 here
        q = max(d for d in range(1, tk_max // 128 + 1) if m128 % d == 0)
        tk = 128 * q
    k_steps = vocab_pad // tk
    needs_k_mask = vocab_pad > vocab_size

    # ---- Row tiling: >= 2 row tiles once blen >= 16 so the "parallel" axis
    # has work for both TensorCores on v7x; tm is a multiple of 8 (or the full
    # row count when blen <= 8) and never exceeds blen.
    if blen <= 8:
        tm = blen
    else:
        tm = min(_round_up((blen + 1) // 2, 8), tm_max)
    grid_m = pl.cdiv(blen, tm)

    kernel = _make_bow_kernel(tk, vocab_size, needs_k_mask)

    out = pl.pallas_call(
        kernel,
        out_shape=jax.ShapeDtypeStruct((blen, num_labels), jnp.float32),
        grid_spec=pltpu.PrefetchScalarGridSpec(
            num_scalar_prefetch=0,
            grid=(grid_m, k_steps),
            in_specs=[
                pl.BlockSpec((tm, tk), lambda i, k: (i, k)),            # X tile
                pl.BlockSpec((tk, num_labels), lambda i, k: (k, 0)),    # W K-slice
                pl.BlockSpec((1, num_labels), lambda i, k: (0, 0)),     # bias
            ],
            out_specs=pl.BlockSpec((tm, num_labels), lambda i, k: (i, 0)),
        ),
        compiler_params=pltpu.CompilerParams(
            dimension_semantics=("parallel", "arbitrary"),
            vmem_limit_bytes=_vmem_limit_bytes(),
        ),
    )(x, w_prep, b_prep)

    return out


if __name__ == "__main__":
    # Small, deterministic shapes consistent with the module.
    num_labels = 4
    vocab_size = 32
    blen = 8

    key = jax.random.PRNGKey(0)
    k_x, k_w, k_b = jax.random.split(key, 3)

    # Deterministic parameter init (uniform, like nn.Linear default scale 1/sqrt(in)).
    bound = 1.0 / (vocab_size ** 0.5)
    weight = jax.random.uniform(k_w, (num_labels, vocab_size), jnp.float32, -bound, bound)
    bias = jax.random.uniform(k_b, (num_labels,), jnp.float32, -bound, bound)

    # Input bag-of-words vectors: (batch=1, blen, vocab_size)
    bow_vec = jax.random.uniform(k_x, (1, blen, vocab_size), jnp.float32, 0.0, 3.0)

    # Parameter prep happens ONCE (hoisted out of the per-call path).
    w_prep, b_prep = jax.block_until_ready(prepare_bow_params(weight, bias))

    out = bow_classifier_forward(bow_vec, w_prep, b_prep)
    out = jax.block_until_ready(out)
    assert out.shape == (blen, num_labels)

    # Reference 1: same bf16-rounded inputs, f32 accumulation (tight tolerance).
    x_bf = bow_vec.reshape(blen, vocab_size).astype(jnp.bfloat16)
    w_bf = weight.astype(jnp.bfloat16)
    logits_bf = jnp.dot(x_bf, w_bf.T, preferred_element_type=jnp.float32) + bias
    ref_bf = jax.nn.log_softmax(logits_bf, axis=-1)
    assert jnp.allclose(out, ref_bf, atol=2e-3, rtol=2e-3), \
        float(jnp.max(jnp.abs(out - ref_bf)))

    # Reference 2: full f32 PyTorch semantics (loose tolerance for bf16 inputs).
    logits_f32 = bow_vec.reshape(blen, vocab_size) @ weight.T + bias
    ref_f32 = jax.nn.log_softmax(logits_f32, axis=-1)
    assert jnp.allclose(out, ref_f32, atol=5e-2, rtol=5e-2)

    print("KERNEL_OK")
</pallas_src>

<mosaic_0001>
module attributes {stable_mosaic.version = 11 : i64} {
  func.func @kernel(%arg0: i32, %arg1: i32, %arg2: memref<8x32xf32, #tpu.memory_space<vmem>>, %arg3: memref<32x4xbf16, #tpu.memory_space<vmem>>, %arg4: memref<1x4xf32, #tpu.memory_space<vmem>>, %arg5: memref<8x4xf32, #tpu.memory_space<vmem>>) attributes {dimension_semantics = [#tpu.dimension_semantics<parallel>, #tpu.dimension_semantics<arbitrary>], iteration_bounds = array<i64: 1, 1>, scalar_prefetch = 0 : i64, scratch_operands = 0 : i64, tpu.core_type = #tpu.core_type<tc>, window_params = [{transform_indices = @transform_0, window_bounds = array<i64: 8, 32>}, {transform_indices = @transform_1, window_bounds = array<i64: 32, 4>}, {pipeline_mode = #tpu.pipeline_mode<synchronous>, transform_indices = @transform_2, window_bounds = array<i64: 1, 4>}, {transform_indices = @transform_3, window_bounds = array<i64: 8, 4>}]} {
    %c0_i32 = arith.constant 0 : i32
    %0 = arith.cmpi eq, %arg1, %c0_i32 : i32
    %1 = arith.extui %0 : i1 to i32
    %c0_i32_0 = arith.constant 0 : i32
    %2 = arith.cmpi ne, %1, %c0_i32_0 : i32
    scf.if %2 {
      %cst_10 = arith.constant 0.000000e+00 : f32
      %13 = vector.broadcast %cst_10 : f32 to vector<8x4xf32>
      %c0_11 = arith.constant 0 : index
      %c0_12 = arith.constant 0 : index
      %14 = vector.load %arg5[%c0_11, %c0_12] : memref<8x4xf32, #tpu.memory_space<vmem>>, vector<8x4xf32>
      tpu.vector_store %arg5[%c0_11, %c0_12], %13 {strides = array<i32>} : memref<8x4xf32, #tpu.memory_space<vmem>>, vector<8x4xf32>,
    } else {
    }
    %c0 = arith.constant 0 : index
    %c0_1 = arith.constant 0 : index
    %3 = vector.load %arg2[%c0, %c0_1] : memref<8x32xf32, #tpu.memory_space<vmem>>, vector<8x32xf32>
    %c0_2 = arith.constant 0 : index
    %c0_3 = arith.constant 0 : index
    %4 = vector.load %arg5[%c0_2, %c0_3] : memref<8x4xf32, #tpu.memory_space<vmem>>, vector<8x4xf32>
    %5 = arith.truncf %3 : vector<8x32xf32> to vector<8x32xbf16>
    %c0_4 = arith.constant 0 : index
    %c0_5 = arith.constant 0 : index
    %6 = vector.load %arg3[%c0_4, %c0_5] : memref<32x4xbf16, #tpu.memory_space<vmem>>, vector<32x4xbf16>
    %cst = arith.constant dense<0.000000e+00> : vector<8x4xf32>
    %7 = tpu.matmul %5, %6, %cst {dimension_numbers = #tpu.dot_dimension_numbers<[1], [0], [0], [1], [0, 0, 1, 1], [], []>} : vector<8x32xbf16>, vector<32x4xbf16>, vector<8x4xf32> -> vector<8x4xf32>
    %8 = arith.addf %4, %7 : vector<8x4xf32>
    %c0_6 = arith.constant 0 : index
    %c0_7 = arith.constant 0 : index
    %9 = vector.load %arg5[%c0_6, %c0_7] : memref<8x4xf32, #tpu.memory_space<vmem>>, vector<8x4xf32>
    tpu.vector_store %arg5[%c0_6, %c0_7], %8 {strides = array<i32>} : memref<8x4xf32, #tpu.memory_space<vmem>>, vector<8x4xf32>,
    %c0_i32_8 = arith.constant 0 : i32
    %10 = arith.cmpi eq, %arg1, %c0_i32_8 : i32
    %11 = arith.extui %10 : i1 to i32
    %c0_i32_9 = arith.constant 0 : i32
    %12 = arith.cmpi ne, %11, %c0_i32_9 : i32
    scf.if %12 {
      %c0_10 = arith.constant 0 : index
      %c0_11 = arith.constant 0 : index
      %13 = vector.load %arg5[%c0_10, %c0_11] : memref<8x4xf32, #tpu.memory_space<vmem>>, vector<8x4xf32>
      %c0_12 = arith.constant 0 : index
      %c0_13 = arith.constant 0 : index
      %14 = vector.load %arg4[%c0_12, %c0_13] : memref<1x4xf32, #tpu.memory_space<vmem>>, vector<1x4xf32>
      %15 = vector.broadcast %14 : vector<1x4xf32> to vector<8x4xf32>
      %16 = arith.addf %13, %15 : vector<8x4xf32>
      %cst_14 = arith.constant dense<0xFF800000> : vector<8xf32>
      %17 = vector.multi_reduction <maximumf>, %16, %cst_14 [1] : vector<8x4xf32> to vector<8xf32>
      %18 = vector.shape_cast %17 : vector<8xf32> to vector<8x1xf32>
      %19 = vector.broadcast %18 : vector<8x1xf32> to vector<8x4xf32>
      %20 = arith.subf %16, %19 : vector<8x4xf32>
      %21 = math.exp %20 : vector<8x4xf32>
      %cst_15 = arith.constant dense<0.000000e+00> : vector<8xf32>
      %22 = vector.multi_reduction <add>, %21, %cst_15 [1] : vector<8x4xf32> to vector<8xf32>
      %23 = vector.shape_cast %22 : vector<8xf32> to vector<8x1xf32>
      %24 = math.log %23 : vector<8x1xf32>
      %25 = vector.broadcast %24 : vector<8x1xf32> to vector<8x4xf32>
      %26 = arith.subf %20, %25 : vector<8x4xf32>
      %c0_16 = arith.constant 0 : index
      %c0_17 = arith.constant 0 : index
      %27 = vector.load %arg5[%c0_16, %c0_17] : memref<8x4xf32, #tpu.memory_space<vmem>>, vector<8x4xf32>
      tpu.vector_store %arg5[%c0_16, %c0_17], %26 {strides = array<i32>} : memref<8x4xf32, #tpu.memory_space<vmem>>, vector<8x4xf32>,
    } else {
    }
    return
  }
  func.func @transform_0(%arg0: i32, %arg1: i32) -> (i32, i32) {
    %c0_i32 = arith.constant 0 : i32
    return %arg0, %arg1 : i32, i32
  }
  func.func @transform_1(%arg0: i32, %arg1: i32) -> (i32, i32) {
    %c0_i32 = arith.constant 0 : i32
    %c0_i32_0 = arith.constant 0 : i32
    return %arg1, %c0_i32 : i32, i32
  }
  func.func @transform_2(%arg0: i32, %arg1: i32) -> (i32, i32) {
    %c0_i32 = arith.constant 0 : i32
    %c0_i32_0 = arith.constant 0 : i32
    %c0_i32_1 = arith.constant 0 : i32
    return %c0_i32, %c0_i32_0 : i32, i32
  }
  func.func @transform_3(%arg0: i32, %arg1: i32) -> (i32, i32) {
    %c0_i32 = arith.constant 0 : i32
    %c0_i32_0 = arith.constant 0 : i32
    return %arg0, %c0_i32 : i32, i32
  }
}

</mosaic_0001>

<bundles_post_ra>
// kernel: tpu_custom_call.1
= control target key start
LH: loop header
LB: loop body
LE: loop exit
PB: predicated region body
PF: predicated region fallthrough
CT: control target
= control target key end

     0   :  { %vm19_vm0 = vcmask 31744   ;;  %v139_v0 = vmov 0.0   ;;  %vm140_vm1 = vmmov 0   ;;  %vm40_vm2 = vcmask 261120   ;;  %s193_s1 = inlined_call_operand.vmem [shape: bf16[32,4], index: 1, kind: input, shape index: {}]   ;;  %s194_s0 = inlined_call_operand.vmem [shape: f32[8,32], index: 0, kind: input, shape index: {}]   ;;  %s195_s3 = inlined_call_operand.vmem [shape: f32[8,4], index: 3, kind: output, shape index: {}]   ;;  %s196_s2 = inlined_call_operand.vmem [shape: f32[1,4], index: 2, kind: input, shape index: {}]  }
   0x1   :  { %123 = vmatprep.subr.bf16.mxu0 %v139_v0  ;;  %v133_v1 = vld [vmem:[%s193_s1 + $0x8] sm:$0xff]   ;;  %127 = vmatprep.mubr.msk.bf16.mxu0 %vm140_vm1, %v139_v0  ;;  %20 = vst.msk [vmem:[%s195_s3] sm:$0xff] %vm19_vm0, %v139_v0  ;;  %v134_v2 = vld [vmem:[%s193_s1] sm:$0xff]  }
   0x2   :  { %124 = vmatpush3.bf16.msra.mxu0 %v133_v1  ;;  %v21_v3 = vld [vmem:[%s194_s0] sm:$0xff] }
   0x3   :  { %125 = vmatprep.subr.bf16.mxu0 %v139_v0  ;;  %v23_v4 = vpack.c.bf16 %v21_v3, %v21_v3  ;;  %v119_v11 = vld [vmem:[%s196_s2] ss:$0 sm:$0xff] }
   0x6   :  { %126 = vmatpush3.bf16.msra.mxu0 %v134_v2 }
   0x8   :  { %v22_v5 = vld [vmem:[%s195_s3] sm:$0xff] }
   0x9   :  { %128 = vmatmul.mubr.msk.bf16.vlgmr.msra.gmra.mxu0 %vm40_vm2, %v23_v4 }
  0xc9   :  { %v78_v6 = vpop.f32.mrf.mxu0 }
  0xca   :  { %v84_v7 = vadd.f32 %v78_v6, %v22_v5 }
  0xcb   :  { %v129_v8 = vpop.f32.mrf.mxu0 }
  0xcc   :  { %86 = vst.msk [vmem:[%s195_s3] sm:$0xff] %vm19_vm0, %v84_v7 }
  0xcd   :  { %v81_v9 = vpop.f32.mrf.mxu0 }
  0xcf   :  { %v130_v10 = vpop.f32.mrf.mxu0 }
  0xd3   :  { %v90_v12 = vld [vmem:[%s195_s3] sm:$0xff] }
  0xd4   :  { %v98_v13 = vadd.f32 %v119_v11, %v90_v12 }
  0xd6   :  { %v99_v14 = vsel %vm19_vm0, %v98_v13, -inf }
  0xd7   :  { %100 = vmax.xlane.f32.xlu0 %v99_v14 }
 0x160   :  { %v101_v15 = vpop.xlane.xlu0 %100 }
 0x161   :  { %v102_v16 = vsub.f32 %v98_v13, %v101_v15 }
 0x163   :  { %v103_v17 = vmul.f32 1.442695, %v102_v16 }
 0x165   :  { %135 = vpow2.f32 %v103_v17 }
 0x172   :  { %v136_v18 = vpop.eup %135 }
 0x173   :  { %v105_v19 = vsel %vm19_vm0, %v136_v18, 0.0 }
 0x174   :  { %106 = vadd.xlane.f32.xlu0 %v105_v19 }
 0x1fd   :  { %v107_v20 = vpop.xlane.xlu0 %106 }
 0x1fe   :  { %137 = vlog2.f32 %v107_v20 }
 0x20b   :  { %v138_v21 = vpop.eup %137 }
 0x20c   :  { %v109_v22 = vmul.f32 0.6931472, %v138_v21 }
 0x20e   :  { %v110_v23 = vsub.f32 %v102_v16, %v109_v22 }
 0x210   :  { %111 = vst.msk [vmem:[%s195_s3] sm:$0xff] %vm19_vm0, %v110_v23 }

</bundles_post_ra>
